<compile_context>
chip_gen: v6e
topology: v6e:2x2x1
jax: 0.10.0
libtpu: 0.0.40
codegen_flags: <defaults>
</compile_context>

<pallas_src>
import math

import jax
import jax.numpy as jnp
from jax.experimental import pallas as pl
from jax.experimental.pallas import tpu as pltpu

H1 = 12
H2 = 8
LANE_TILE = 128  # lane width: batch tiles are multiples of this


def _round_up(n, m):
    return ((n + m - 1) // m) * m


def _dqn_kernel(x_ref, w1_ref, b1_ref, w2_ref, b2_ref, w3_ref, b3_ref, q_ref):
    # Batch-on-lanes layout: x_ref is (input_dim, tile_b); weights are PyTorch
    # [out, in] layout and stay VMEM-resident across all grid steps (constant
    # index_map).  Dot inputs are cast to the weight dtype (bf16 fast path,
    # single-pass MXU); accumulation, bias add and ReLU stay in f32.
    x = x_ref[...].astype(w1_ref.dtype)
    h1 = jnp.dot(w1_ref[...], x, preferred_element_type=jnp.float32) + b1_ref[...]
    h1 = jnp.maximum(h1, 0.0).astype(w2_ref.dtype)
    h2 = jnp.dot(w2_ref[...], h1, preferred_element_type=jnp.float32) + b2_ref[...]
    h2 = jnp.maximum(h2, 0.0).astype(w3_ref.dtype)
    q = jnp.dot(w3_ref[...], h2, preferred_element_type=jnp.float32) + b3_ref[...]
    q_ref[...] = q.astype(q_ref.dtype)


def dqn_forward(x, prepared_params, *, tile_b=None):
    """Fused DQN forward.

    x: [B, input_dim] (any float dtype).
    prepared_params: output of prepare_params() -- weights [out, in] in the
      compute dtype, biases [out, 1] f32.
    Returns Q: [B, num_actions] float32.
    """
    w1, b1, w2, b2, w3, b3 = prepared_params
    B, input_dim = x.shape
    num_actions = w3.shape[0]

    # Batch tile: multiple of 128 lanes, large (default up to 4096) to amortize
    # per-grid-step overhead, but capped so batches >= 2 lane-tiles keep >= 2
    # grid steps (v7x megacore sharding of the "parallel" batch axis).
    b_lane = _round_up(B, LANE_TILE)
    if tile_b is None:
        tile_b = 4096
        if b_lane >= 2 * LANE_TILE:
            tile_b = min(tile_b, b_lane // 2)
    tile_b = max(LANE_TILE, _round_up(min(tile_b, b_lane), LANE_TILE))
    b_pad = _round_up(B, tile_b)
    grid = (b_pad // tile_b,)

    # Batch-on-lanes layout plumbing: transpose + lane-pad x.  Every HBM byte
    # the kernel moves is real data; the output store is lane-dense.
    xt = jnp.transpose(x)
    if b_pad != B:
        xt = jnp.pad(xt, ((0, 0), (0, b_pad - B)))

    itemsize = lambda a: a.size * a.dtype.itemsize
    flops = 2 * b_pad * (input_dim * H1 + H1 * H2 + H2 * num_actions)
    bytes_accessed = (
        itemsize(xt)
        + num_actions * b_pad * 4
        + sum(itemsize(a) for a in (w1, b1, w2, b2, w3, b3))
    )
    cost = pl.CostEstimate(
        flops=flops, transcendentals=0, bytes_accessed=bytes_accessed
    )

    # Weights/biases: full-array blocks, resident in VMEM across the grid.
    full = lambda a: pl.BlockSpec(a.shape, lambda i: (0, 0))
    qt = pl.pallas_call(
        _dqn_kernel,
        out_shape=jax.ShapeDtypeStruct((num_actions, b_pad), jnp.float32),
        grid=grid,
        in_specs=[
            pl.BlockSpec((input_dim, tile_b), lambda i: (0, i)),  # x batch tile
            full(w1), full(b1), full(w2), full(b2), full(w3), full(b3),
        ],
        out_specs=pl.BlockSpec((num_actions, tile_b), lambda i: (0, i)),
        compiler_params=pltpu.CompilerParams(
            dimension_semantics=("parallel",),
        ),
        cost_estimate=cost,
    )(xt, w1, b1, w2, b2, w3, b3)

    return jnp.transpose(qt[:, :B])


def prepare_params(torch_layout_params, *, compute_dtype=jnp.bfloat16):
    """One-time packing of PyTorch-layout nn.Linear params for the kernel.

    torch_layout_params: (w1, b1, w2, b2, w3, b3) with w_i: [out, in], b_i: [out].
    Weights are cast to compute_dtype (bf16 fast MXU path by default; pass
    jnp.float32 for full precision); biases become f32 [out, 1] columns.
    Doing this once per parameter update removes per-call param reshaping and
    scatters from the forward path.
    """
    w1, b1, w2, b2, w3, b3 = torch_layout_params
    prep_w = lambda w: jnp.asarray(w, compute_dtype)
    prep_b = lambda b: jnp.asarray(b, jnp.float32).reshape(-1, 1)
    return (prep_w(w1), prep_b(b1), prep_w(w2), prep_b(b2), prep_w(w3), prep_b(b3))


def _kaiming_uniform(key, out_features, in_features):
    # PyTorch nn.init.kaiming_uniform_(w, nonlinearity='relu'), weight [out, in]:
    # gain = sqrt(2), bound = gain * sqrt(3 / fan_in).
    bound = math.sqrt(2.0) * math.sqrt(3.0 / in_features)
    return jax.random.uniform(
        key, (out_features, in_features), dtype=jnp.float32,
        minval=-bound, maxval=bound,
    )


def _linear_bias(key, out_features, in_features):
    # PyTorch nn.Linear default bias init: U(-1/sqrt(fan_in), 1/sqrt(fan_in)).
    bound = 1.0 / math.sqrt(in_features)
    return jax.random.uniform(
        key, (out_features,), dtype=jnp.float32, minval=-bound, maxval=bound
    )


def init_dqn_params(key, input_dim, num_actions):
    """PyTorch-layout parameters: weight [out, in], bias [out]."""
    ks = jax.random.split(key, 6)
    w1 = _kaiming_uniform(ks[0], H1, input_dim)
    b1 = _linear_bias(ks[1], H1, input_dim)
    w2 = _kaiming_uniform(ks[2], H2, H1)
    b2 = _linear_bias(ks[3], H2, H1)
    w3 = _kaiming_uniform(ks[4], num_actions, H2)
    b3 = _linear_bias(ks[5], num_actions, H2)
    return (w1, b1, w2, b2, w3, b3)


def _reference(x, prepared_params):
    """Pure-JAX reference matching the kernel's dot-input dtype."""
    w1, b1, w2, b2, w3, b3 = prepared_params
    cdt = w1.dtype
    f32 = jnp.float32
    h1 = jnp.dot(x.astype(cdt), w1.T, preferred_element_type=f32) + b1.T
    h1 = jnp.maximum(h1, 0.0)
    h2 = jnp.dot(h1.astype(cdt), w2.T, preferred_element_type=f32) + b2.T
    h2 = jnp.maximum(h2, 0.0)
    return jnp.dot(h2.astype(cdt), w3.T, preferred_element_type=f32) + b3.T


if __name__ == "__main__":
    input_dim = 4     # CartPole state dim
    num_actions = 2

    key = jax.random.PRNGKey(0)
    pkey, xkey, xkey2 = jax.random.split(key, 3)
    raw_params = init_dqn_params(pkey, input_dim, num_actions)

    # Small inference-style (actor) batch, full-precision params.
    params_f32 = prepare_params(raw_params, compute_dtype=jnp.float32)
    batch = 8
    x = jax.random.normal(xkey, (batch, input_dim), dtype=jnp.float32)
    q = jax.block_until_ready(dqn_forward(x, params_f32))
    assert q.shape == (batch, num_actions)
    assert jnp.allclose(q, _reference(x, params_f32), atol=1e-2, rtol=1e-2)

    # Large training-style batch: bf16 dot-input fast path, multi-tile grid
    # (tile_b defaults so the grid has >=2 steps -> both v7x TCs are used).
    params_bf16 = prepare_params(raw_params)  # bf16 weights, f32 biases
    big_batch = 4096
    xb = jax.random.normal(xkey2, (big_batch, input_dim), dtype=jnp.float32)
    qb = jax.block_until_ready(dqn_forward(xb, params_bf16))
    assert qb.shape == (big_batch, num_actions)
    assert jnp.allclose(qb, _reference(xb, params_bf16), atol=2e-2, rtol=2e-2)

    print("KERNEL_OK")
</pallas_src>

<mosaic_0001>
module attributes {stable_mosaic.version = 11 : i64} {
  func.func @_dqn_kernel(%arg0: i32, %arg1: memref<4x128xf32, #tpu.memory_space<vmem>>, %arg2: memref<12x4xf32, #tpu.memory_space<vmem>>, %arg3: memref<12x1xf32, #tpu.memory_space<vmem>>, %arg4: memref<8x12xf32, #tpu.memory_space<vmem>>, %arg5: memref<8x1xf32, #tpu.memory_space<vmem>>, %arg6: memref<2x8xf32, #tpu.memory_space<vmem>>, %arg7: memref<2x1xf32, #tpu.memory_space<vmem>>, %arg8: memref<2x128xf32, #tpu.memory_space<vmem>>) attributes {dimension_semantics = [#tpu.dimension_semantics<parallel>], iteration_bounds = array<i64: 1>, scalar_prefetch = 0 : i64, scratch_operands = 0 : i64, tpu.core_type = #tpu.core_type<tc>, window_params = [{transform_indices = @transform_0, window_bounds = array<i64: 4, 128>}, {pipeline_mode = #tpu.pipeline_mode<synchronous>, transform_indices = @transform_1, window_bounds = array<i64: 12, 4>}, {pipeline_mode = #tpu.pipeline_mode<synchronous>, transform_indices = @transform_2, window_bounds = array<i64: 12, 1>}, {pipeline_mode = #tpu.pipeline_mode<synchronous>, transform_indices = @transform_3, window_bounds = array<i64: 8, 12>}, {pipeline_mode = #tpu.pipeline_mode<synchronous>, transform_indices = @transform_4, window_bounds = array<i64: 8, 1>}, {pipeline_mode = #tpu.pipeline_mode<synchronous>, transform_indices = @transform_5, window_bounds = array<i64: 2, 8>}, {pipeline_mode = #tpu.pipeline_mode<synchronous>, transform_indices = @transform_6, window_bounds = array<i64: 2, 1>}, {transform_indices = @transform_7, window_bounds = array<i64: 2, 128>}]} {
    %c0 = arith.constant 0 : index
    %c0_0 = arith.constant 0 : index
    %0 = vector.load %arg1[%c0, %c0_0] : memref<4x128xf32, #tpu.memory_space<vmem>>, vector<4x128xf32>
    %c0_1 = arith.constant 0 : index
    %c0_2 = arith.constant 0 : index
    %1 = vector.load %arg2[%c0_1, %c0_2] : memref<12x4xf32, #tpu.memory_space<vmem>>, vector<12x4xf32>
    %cst = arith.constant dense<0.000000e+00> : vector<12x128xf32>
    %2 = tpu.matmul %1, %0, %cst {dimension_numbers = #tpu.dot_dimension_numbers<[1], [0], [0], [1], [0, 0, 1, 1], [], []>} : vector<12x4xf32>, vector<4x128xf32>, vector<12x128xf32> -> vector<12x128xf32>
    %c0_3 = arith.constant 0 : index
    %c0_4 = arith.constant 0 : index
    %3 = vector.load %arg3[%c0_3, %c0_4] : memref<12x1xf32, #tpu.memory_space<vmem>>, vector<12x1xf32>
    %4 = vector.broadcast %3 : vector<12x1xf32> to vector<12x128xf32>
    %5 = arith.addf %2, %4 : vector<12x128xf32>
    %cst_5 = arith.constant 0.000000e+00 : f32
    %6 = vector.broadcast %cst_5 : f32 to vector<12x128xf32>
    %7 = arith.maximumf %5, %6 : vector<12x128xf32>
    %c0_6 = arith.constant 0 : index
    %c0_7 = arith.constant 0 : index
    %8 = vector.load %arg4[%c0_6, %c0_7] : memref<8x12xf32, #tpu.memory_space<vmem>>, vector<8x12xf32>
    %cst_8 = arith.constant dense<0.000000e+00> : vector<8x128xf32>
    %9 = tpu.matmul %8, %7, %cst_8 {dimension_numbers = #tpu.dot_dimension_numbers<[1], [0], [0], [1], [0, 0, 1, 1], [], []>} : vector<8x12xf32>, vector<12x128xf32>, vector<8x128xf32> -> vector<8x128xf32>
    %c0_9 = arith.constant 0 : index
    %c0_10 = arith.constant 0 : index
    %10 = vector.load %arg5[%c0_9, %c0_10] : memref<8x1xf32, #tpu.memory_space<vmem>>, vector<8x1xf32>
    %11 = vector.broadcast %10 : vector<8x1xf32> to vector<8x128xf32>
    %12 = arith.addf %9, %11 : vector<8x128xf32>
    %cst_11 = arith.constant 0.000000e+00 : f32
    %13 = vector.broadcast %cst_11 : f32 to vector<8x128xf32>
    %14 = arith.maximumf %12, %13 : vector<8x128xf32>
    %c0_12 = arith.constant 0 : index
    %c0_13 = arith.constant 0 : index
    %15 = vector.load %arg6[%c0_12, %c0_13] : memref<2x8xf32, #tpu.memory_space<vmem>>, vector<2x8xf32>
    %cst_14 = arith.constant dense<0.000000e+00> : vector<2x128xf32>
    %16 = tpu.matmul %15, %14, %cst_14 {dimension_numbers = #tpu.dot_dimension_numbers<[1], [0], [0], [1], [0, 0, 1, 1], [], []>} : vector<2x8xf32>, vector<8x128xf32>, vector<2x128xf32> -> vector<2x128xf32>
    %c0_15 = arith.constant 0 : index
    %c0_16 = arith.constant 0 : index
    %17 = vector.load %arg7[%c0_15, %c0_16] : memref<2x1xf32, #tpu.memory_space<vmem>>, vector<2x1xf32>
    %18 = vector.broadcast %17 : vector<2x1xf32> to vector<2x128xf32>
    %19 = arith.addf %16, %18 : vector<2x128xf32>
    %c0_17 = arith.constant 0 : index
    %c0_18 = arith.constant 0 : index
    %20 = vector.load %arg8[%c0_17, %c0_18] : memref<2x128xf32, #tpu.memory_space<vmem>>, vector<2x128xf32>
    tpu.vector_store %arg8[%c0_17, %c0_18], %19 {strides = array<i32>} : memref<2x128xf32, #tpu.memory_space<vmem>>, vector<2x128xf32>,
    return
  }
  func.func @transform_0(%arg0: i32) -> (i32, i32) {
    %c0_i32 = arith.constant 0 : i32
    %c0_i32_0 = arith.constant 0 : i32
    return %c0_i32, %arg0 : i32, i32
  }
  func.func @transform_1(%arg0: i32) -> (i32, i32) {
    %c0_i32 = arith.constant 0 : i32
    %c0_i32_0 = arith.constant 0 : i32
    %c0_i32_1 = arith.constant 0 : i32
    return %c0_i32, %c0_i32_0 : i32, i32
  }
  func.func @transform_2(%arg0: i32) -> (i32, i32) {
    %c0_i32 = arith.constant 0 : i32
    %c0_i32_0 = arith.constant 0 : i32
    %c0_i32_1 = arith.constant 0 : i32
    return %c0_i32, %c0_i32_0 : i32, i32
  }
  func.func @transform_3(%arg0: i32) -> (i32, i32) {
    %c0_i32 = arith.constant 0 : i32
    %c0_i32_0 = arith.constant 0 : i32
    %c0_i32_1 = arith.constant 0 : i32
    return %c0_i32, %c0_i32_0 : i32, i32
  }
  func.func @transform_4(%arg0: i32) -> (i32, i32) {
    %c0_i32 = arith.constant 0 : i32
    %c0_i32_0 = arith.constant 0 : i32
    %c0_i32_1 = arith.constant 0 : i32
    return %c0_i32, %c0_i32_0 : i32, i32
  }
  func.func @transform_5(%arg0: i32) -> (i32, i32) {
    %c0_i32 = arith.constant 0 : i32
    %c0_i32_0 = arith.constant 0 : i32
    %c0_i32_1 = arith.constant 0 : i32
    return %c0_i32, %c0_i32_0 : i32, i32
  }
  func.func @transform_6(%arg0: i32) -> (i32, i32) {
    %c0_i32 = arith.constant 0 : i32
    %c0_i32_0 = arith.constant 0 : i32
    %c0_i32_1 = arith.constant 0 : i32
    return %c0_i32, %c0_i32_0 : i32, i32
  }
  func.func @transform_7(%arg0: i32) -> (i32, i32) {
    %c0_i32 = arith.constant 0 : i32
    %c0_i32_0 = arith.constant 0 : i32
    return %c0_i32, %arg0 : i32, i32
  }
}

</mosaic_0001>

<bundles_post_ra>
// kernel: tpu_custom_call.1
= control target key start
LH: loop header
LB: loop body
LE: loop exit
PB: predicated region body
PF: predicated region fallthrough
CT: control target
= control target key end

     0   :  { %vm49_vm0 = vcmask 1043456   ;;  %vm42_vm1 = vcmask 31744   ;;  %v370_v4 = vmov 0   ;;  %s447_s0 = inlined_call_operand.vmem [shape: f32[4,128], index: 0, kind: input, shape index: {}]   ;;  %s448_s1 = inlined_call_operand.vmem [shape: f32[12,4], index: 1, kind: input, shape index: {}]   ;;  %s449_s2 = inlined_call_operand.vmem [shape: f32[12,1], index: 2, kind: input, shape index: {}]   ;;  %s450_s3 = inlined_call_operand.vmem [shape: f32[8,12], index: 3, kind: input, shape index: {}]   ;;  %s451_s4 = inlined_call_operand.vmem [shape: f32[8,1], index: 4, kind: input, shape index: {}]   ;;  %s452_s5 = inlined_call_operand.vmem [shape: f32[2,8], index: 5, kind: input, shape index: {}]   ;;  %s453_s6 = inlined_call_operand.vmem [shape: f32[2,1], index: 6, kind: input, shape index: {}]   ;;  %s454_s7 = inlined_call_operand.hbm [shape: f32[2,128], index: 7, kind: output, shape index: {}]  }
   0x1   :  { %v27_v0 = vld [vmem:[%s447_s0] sm:$0xf]  ;;  %v29_v2 = vld [vmem:[%s448_s1 + $0x8] sm:$0xf]  ;;  %346 = vset.pattern.permute.xlu0 %v370_v4 }
   0x2   :  { %v28_v1 = vld [vmem:[%s448_s1] sm:$0xff]  ;;  %325 = vmatprep.subr.msk.mxu0 %vm49_vm0, %v27_v0  ;;  %v31_v3 = vld [vmem:[%s449_s2 + $0x8] sm:$0xf] }
   0x3   :  { %327 = vmatprep.mubr.msk.f32.mxu0 %vm42_vm1, %v28_v1  ;;  %326 = vmatpush3.msk.msra.mxu0 %vm49_vm0, %v27_v0 }
   0x4   :  { %12 = vsyncpa [#allocation3], 0  ;;  %328 = vmatmul.mubr.msk.f32.vlgmr.msra.gmra.mxu0 %vm42_vm1, %v29_v2  ;;  %39 = vperm.xlu0 %346, %v31_v3   ;;  %v30_v5 = vld [vmem:[%s449_s2] sm:$0xff]  ;;  %v371_v6 = vmov 0.0   ;;  %vm372_vm2 = vmmov 0   ;;  %vm137_vm3 = vcmask 97280  }
   0x5   :  { %347 = vset.pattern.permute.xlu1 %v370_v4  ;;  %330 = vmatprep.subr.mxu1 %v371_v6  ;;  %v131_v7 = vld [vmem:[%s451_s4] sm:$0xff]  ;;  %vm222_vm4 = vcmask 64512   ;;  %s373_s14 = smov [#allocation2]  }
   0x6   :  { %337 = vmatprep.subr.mxu0 %v371_v6  ;;  %334 = vmatprep.mubr.msk.f32.mxu1 %vm372_vm2, %v371_v6  ;;  %v216_v8 = vld [vmem:[%s453_s6] sm:$0x3]  ;;  %s303_s15 = sshll.u32 %s373_s14, 4  ;;  %s304_s15 = int_to_ptr.vmem [resolvable:$true] %s303_s15 }
   0x7   :  { %339 = vmatprep.mubr.msk.f32.mxu0 %vm372_vm2, %v371_v6  ;;  %134 = vperm.xlu1 %347, %v131_v7   ;;  %v130_v17 = vld [vmem:[%s450_s3] sm:$0xff]  ;;  %s348_s3 = scalar_lea.vmem %s304_s15, 32  ;;  %p353_p1 = scmp.lt.s32.totalorder %s304_s15, %s304_s15 }
   0x8   :  { %34 = vperm.xlu0 %346, %v30_v5   ;;  %v215_v23 = vld [vmem:[%s452_s5] sm:$0x3]  ;;  %p349_p0 = scmp.ne.s32.totalorder %s304_s15, %s348_s3  ;;  %p354_p2 = scmp.lt.s32.totalorder %s348_s3, %s348_s3 }
   0xa   :  { %p355_p3 = por %p354_p2, %p353_p1 }
   0xb   :  { %219 = vperm.xlu1 %347, %v216_v8  }
   0xc   :  { %p356_p4 = pnand %p355_p3, %p349_p0 }
  0x7f   :  { %v40_v9 = vpop.permute.xlu0 %39 }
  0x82   :  { %v135_v18 = vpop.permute.xlu1 %134 }
  0x83   :  { %v35_v12 = vpop.permute.xlu0 %34 }
  0x86   :  { %v220_v24 = vpop.permute.xlu1 %219 }
  0xc4   :  { %v329_v10 = vpop.f32.mrf.mxu0 }
  0xc5   :  { %v125_v11 = vadd.f32 %v329_v10, %v40_v9 }
  0xc6   :  { %v119_v13 = vpop.f32.mrf.mxu0 }
  0xc7   :  { %v129_v14 = vmax.f32 %v125_v11, 0.0  ;;  %v120_v15 = vadd.f32 %v119_v13, %v35_v12 }
  0xc9   :  { %v128_v16 = vmax.f32 %v120_v15, 0.0  ;;  %331 = vmatpush3.msk.msra.mxu1 %vm49_vm0, %v129_v14 }
  0xca   :  { %332 = vmatprep.subr.mxu1 %v371_v6 }
  0xcb   :  { %333 = vmatpush3.msra.mxu1 %v128_v16 }
  0xcc   :  { %335 = vmatmul.mubr.msk.f32.vlgmr.msra.gmra.mxu1 %vm137_vm3, %v130_v17 }
 0x18c   :  { %v210_v19 = vpop.f32.mrf.mxu1 }
 0x18d   :  { %v211_v20 = vadd.f32 %v210_v19, %v135_v18 }
 0x18e   :  { %v336_v21 = vpop.f32.mrf.mxu1 }
 0x18f   :  { %v214_v22 = vmax.f32 %v211_v20, 0.0 }
 0x191   :  { %338 = vmatpush3.msra.mxu0 %v214_v22 }
 0x192   :  { %340 = vmatmul.mubr.msk.f32.vlgmr.msra.gmra.mxu0 %vm222_vm4, %v215_v23 }
 0x252   :  { %v292_v25 = vpop.f32.mrf.mxu0 }
 0x253   :  { %v293_v26 = vadd.f32 %v292_v25, %v220_v24 }
 0x254   :  { %v341_v27 = vpop.f32.mrf.mxu0 }
 0x255   :  { %296 = vst [vmem:[#allocation2] sm:$0x3] %v293_v26 }
 0x256   :  { %359 = shalt.err (!%p356_p4)
}
 0x257   :  { %306 = dma.vmem_to_hbm [thread:$0]  %s304_s15, 32, %s454_s7, [#allocation3]  }
 0x258   :  { %368 = dma.done.wait [#allocation3], 32  }
 0x259   :  { %369 = vsyncadd [#allocation3], 4294967264 }
 0x25a   :  { %310 = vsyncpa [#allocation3], 1 }

</bundles_post_ra>
